<compile_context>
chip_gen: v7x
topology: tpu7x:2x2x1
jax: 0.10.0
libtpu: 0.0.40
codegen_flags: <defaults>
</compile_context>

<pallas_src>
import functools
import math

import jax
import jax.numpy as jnp
from jax import lax
from jax.experimental import pallas as pl
from jax.experimental.pallas import tpu as pltpu


def _round_up(x, m):
    return ((x + m - 1) // m) * m


def temporal_decay_kernel(d_ref, w_ref, b_ref, o_ref, *, use_bf16_matmul):
    d_blk = d_ref[...]          # [tile, D]
    w = w_ref[...]              # [H, D]  (PyTorch layout, no transpose)
    if use_bf16_matmul:
        d_blk = d_blk.astype(jnp.bfloat16)
        w = w.astype(jnp.bfloat16)
    # Contract d's last dim with W's last dim on the MXU; accumulate in f32.
    z = lax.dot_general(
        d_blk, w,
        dimension_numbers=(((1,), (1,)), ((), ())),
        preferred_element_type=jnp.float32,
    )                            # [tile, H]
    z = z + b_ref[...]           # broadcast (1, H) over rows (VPU)
    gamma = jnp.exp(-jnp.maximum(z, 0.0))   # relu -> negate -> exp (VPU + EUP)
    o_ref[...] = gamma.astype(o_ref.dtype)


def temporal_decay(d, W, b, *, tile_rows=512, use_bf16_matmul=False):
    """gamma = exp(-relu(linear(d, W, b))).

    d: [..., D] (any leading dims, e.g. [B, D] or [B, T, D])
    W: [H, D] (PyTorch convention), b: [H]
    returns gamma: [..., H]
    """
    lead_shape = d.shape[:-1]
    D = d.shape[-1]
    H = W.shape[0]

    # Flatten all leading dims into one "rows" axis (free collapse for
    # contiguous arrays) so all timesteps/batch entries go through one call.
    rows = d.reshape(-1, D)
    N = rows.shape[0]

    # Row tile: multiple of 8 (sublane), capped by the (padded) row count.
    tile_n = min(tile_rows, _round_up(N, 8))
    n_pad = _round_up(N, tile_n)
    if n_pad != N:
        rows = jnp.pad(rows, ((0, n_pad - N), (0, 0)))

    b2 = b.reshape(1, H)

    kernel = functools.partial(
        temporal_decay_kernel, use_bf16_matmul=use_bf16_matmul
    )

    out = pl.pallas_call(
        kernel,
        out_shape=jax.ShapeDtypeStruct((n_pad, H), d.dtype),
        grid=(n_pad // tile_n,),
        in_specs=[
            pl.BlockSpec((tile_n, D), lambda i: (i, 0)),   # d rows: tiled, pipelined
            pl.BlockSpec((H, D), lambda i: (0, 0)),        # W: whole, VMEM-resident
            pl.BlockSpec((1, H), lambda i: (0, 0)),        # b: whole, VMEM-resident
        ],
        out_specs=pl.BlockSpec((tile_n, H), lambda i: (i, 0)),
        compiler_params=pltpu.CompilerParams(
            dimension_semantics=("parallel",),             # megacore-shardable on v7x
        ),
    )(rows, W, b2)

    if n_pad != N:
        out = out[:N]
    return out.reshape(lead_shape + (H,))


if __name__ == "__main__":
    # Small shapes consistent with the module: a RITS-style sequence
    # batch=8, seq=8 timesteps, input_size=16, hidden=32 — all timesteps
    # handled by a single kernel launch.
    B, T, INPUT_SIZE, RNN_HID_SIZE = 8, 8, 16, 32

    key = jax.random.PRNGKey(0)
    k_d, k_w, k_b = jax.random.split(key, 3)

    # Deterministic parameter init matching reset_parameters():
    # uniform(-stdv, stdv) with stdv = 1 / sqrt(RNN_HID_SIZE).
    stdv = 1.0 / math.sqrt(RNN_HID_SIZE)
    W = jax.random.uniform(
        k_w, (RNN_HID_SIZE, INPUT_SIZE), jnp.float32, minval=-stdv, maxval=stdv
    )
    b = jax.random.uniform(
        k_b, (RNN_HID_SIZE,), jnp.float32, minval=-stdv, maxval=stdv
    )

    # Example input "d" (time-delta features in RITS are non-negative).
    d = jax.random.uniform(
        k_d, (B, T, INPUT_SIZE), jnp.float32, minval=0.0, maxval=5.0
    )

    # Fused-sequence path ([B, T, D] in one pallas_call).
    gamma = jax.block_until_ready(temporal_decay(d, W, b))
    ref = jnp.exp(-jnp.maximum(jnp.einsum("btd,hd->bth", d, W) + b, 0.0))
    assert gamma.shape == (B, T, RNN_HID_SIZE)
    assert jnp.allclose(gamma, ref, atol=1e-5, rtol=1e-5)

    # Plain 2-D path ([B, D], matches the module's forward signature exactly),
    # including a row count that is not a multiple of 8 (exercises padding).
    d2 = d[:5, 0, :]
    gamma2 = jax.block_until_ready(temporal_decay(d2, W, b))
    ref2 = jnp.exp(-jnp.maximum(d2 @ W.T + b, 0.0))
    assert gamma2.shape == (5, RNN_HID_SIZE)
    assert jnp.allclose(gamma2, ref2, atol=1e-5, rtol=1e-5)

    # bf16-matmul path (production-size option on v6e/v7x); loose tolerance.
    gamma_bf = jax.block_until_ready(temporal_decay(d, W, b, use_bf16_matmul=True))
    assert jnp.allclose(gamma_bf, ref, atol=5e-2, rtol=5e-2)

    print("KERNEL_OK")
</pallas_src>

<mosaic_0001>
module attributes {stable_mosaic.version = 11 : i64} {
  func.func @temporal_decay_kernel(%arg0: i32, %arg1: memref<64x16xf32, #tpu.memory_space<vmem>>, %arg2: memref<32x16xf32, #tpu.memory_space<vmem>>, %arg3: memref<1x32xf32, #tpu.memory_space<vmem>>, %arg4: memref<64x32xf32, #tpu.memory_space<vmem>>) attributes {dimension_semantics = [#tpu.dimension_semantics<parallel>], iteration_bounds = array<i64: 1>, scalar_prefetch = 0 : i64, scratch_operands = 0 : i64, tpu.core_type = #tpu.core_type<tc>, window_params = [{transform_indices = @transform_0, window_bounds = array<i64: 64, 16>}, {pipeline_mode = #tpu.pipeline_mode<synchronous>, transform_indices = @transform_1, window_bounds = array<i64: 32, 16>}, {pipeline_mode = #tpu.pipeline_mode<synchronous>, transform_indices = @transform_2, window_bounds = array<i64: 1, 32>}, {transform_indices = @transform_3, window_bounds = array<i64: 64, 32>}]} {
    %c0 = arith.constant 0 : index
    %c0_0 = arith.constant 0 : index
    %0 = vector.load %arg1[%c0, %c0_0] : memref<64x16xf32, #tpu.memory_space<vmem>>, vector<64x16xf32>
    %c0_1 = arith.constant 0 : index
    %c0_2 = arith.constant 0 : index
    %1 = vector.load %arg2[%c0_1, %c0_2] : memref<32x16xf32, #tpu.memory_space<vmem>>, vector<32x16xf32>
    %cst = arith.constant dense<0.000000e+00> : vector<64x32xf32>
    %2 = tpu.matmul %0, %1, %cst {dimension_numbers = #tpu.dot_dimension_numbers<[1], [1], [0], [0], [0, 0, 1, 0], [], []>} : vector<64x16xf32>, vector<32x16xf32>, vector<64x32xf32> -> vector<64x32xf32>
    %c0_3 = arith.constant 0 : index
    %c0_4 = arith.constant 0 : index
    %3 = vector.load %arg3[%c0_3, %c0_4] : memref<1x32xf32, #tpu.memory_space<vmem>>, vector<1x32xf32>
    %4 = vector.broadcast %3 : vector<1x32xf32> to vector<64x32xf32>
    %5 = arith.addf %2, %4 : vector<64x32xf32>
    %cst_5 = arith.constant 0.000000e+00 : f32
    %6 = vector.broadcast %cst_5 : f32 to vector<64x32xf32>
    %7 = arith.maximumf %5, %6 : vector<64x32xf32>
    %cst_6 = arith.constant 0.000000e+00 : f32
    %8 = vector.broadcast %cst_6 : f32 to vector<64x32xf32>
    %9 = arith.subf %8, %7 : vector<64x32xf32>
    %10 = math.exp %9 : vector<64x32xf32>
    %c0_7 = arith.constant 0 : index
    %c0_8 = arith.constant 0 : index
    %11 = vector.load %arg4[%c0_7, %c0_8] : memref<64x32xf32, #tpu.memory_space<vmem>>, vector<64x32xf32>
    tpu.vector_store %arg4[%c0_7, %c0_8], %10 {strides = array<i32>} : memref<64x32xf32, #tpu.memory_space<vmem>>, vector<64x32xf32>,
    return
  }
  func.func @transform_0(%arg0: i32) -> (i32, i32) {
    %c0_i32 = arith.constant 0 : i32
    %c0_i32_0 = arith.constant 0 : i32
    return %arg0, %c0_i32 : i32, i32
  }
  func.func @transform_1(%arg0: i32) -> (i32, i32) {
    %c0_i32 = arith.constant 0 : i32
    %c0_i32_0 = arith.constant 0 : i32
    %c0_i32_1 = arith.constant 0 : i32
    return %c0_i32, %c0_i32_0 : i32, i32
  }
  func.func @transform_2(%arg0: i32) -> (i32, i32) {
    %c0_i32 = arith.constant 0 : i32
    %c0_i32_0 = arith.constant 0 : i32
    %c0_i32_1 = arith.constant 0 : i32
    return %c0_i32, %c0_i32_0 : i32, i32
  }
  func.func @transform_3(%arg0: i32) -> (i32, i32) {
    %c0_i32 = arith.constant 0 : i32
    %c0_i32_0 = arith.constant 0 : i32
    return %arg0, %c0_i32 : i32, i32
  }
}

</mosaic_0001>

<bundles_post_ra>
// kernel: tpu_custom_call.1
= control target key start
LH: loop header
LB: loop body
LE: loop exit
PB: predicated region body
PF: predicated region fallthrough
CT: control target
= control target key end

     0   :  { %vm33_vm0 = vcmask 130048   ;;  %vm207_vm2 = vcmask 261120   ;;  %s418_s1 = inlined_call_operand.vmem [shape: f32[32,16], index: 1, kind: input, shape index: {}]   ;;  %s419_s0 = inlined_call_operand.vmem [shape: f32[64,16], index: 0, kind: input, shape index: {}]   ;;  %s420_s2 = inlined_call_operand.vmem [shape: f32[1,32], index: 2, kind: input, shape index: {}]   ;;  %s421_s3 = inlined_call_operand.vmem [shape: f32[64,32], index: 3, kind: output, shape index: {}]  }
   0x1   :  { %v22_v0 = vld [vmem:[%s418_s1] sm:$0xff]  ;;  %v23_v1 = vld [vmem:[%s418_s1 + $0x8] sm:$0xff]  ;;  %vm325_vm1 = vmpackc.low %vm33_vm0, %vm33_vm0 }
   0x2   :  { %v265_v3 = vpack.c.bf16 %v23_v1, %v22_v0  ;;  %v24_v4 = vld [vmem:[%s418_s1 + $0x10] sm:$0xff]  ;;  %v25_v5 = vld [vmem:[%s418_s1 + $0x18] sm:$0xff]  ;;  %v14_v6 = vld [vmem:[%s419_s0] sm:$0xff] }
   0x3   :  { %v271_v7 = vpack.c.bf16 %v25_v5, %v24_v4  ;;  %253 = vmatprep.mubr.msk.f32.mxu0 %vm33_vm0, %v14_v6  ;;  %v18_v8 = vld [vmem:[%s419_s0 + $0x20] sm:$0xff]  ;;  %v15_v9 = vld [vmem:[%s419_s0 + $0x8] sm:$0xff]  ;;  %v16_v11 = vld [vmem:[%s419_s0 + $0x10] sm:$0xff] }
   0x4   :  { %267 = vmatprep.subr.msk.bf16.mxu0 %vm325_vm1, %v265_v3  ;;  %277 = vmatprep.subr.msk.bf16.mxu1 %vm325_vm1, %v265_v3  ;;  %v19_v10 = vld [vmem:[%s419_s0 + $0x28] sm:$0xff]  ;;  %v20_v12 = vld [vmem:[%s419_s0 + $0x30] sm:$0xff]  ;;  %v17_v13 = vld [vmem:[%s419_s0 + $0x18] sm:$0xff] }
   0x5   :  { %270 = vmatpush3.bf16.xpose.msk.msra.mxu0 %vm325_vm1, %v265_v3  ;;  %279 = vmatpush3.bf16.xpose.msk.msra.mxu1 %vm325_vm1, %v265_v3  ;;  %v21_v14 = vld [vmem:[%s419_s0 + $0x38] sm:$0xff]  ;;  %v220_v15 = vld [vmem:[%s420_s2] ss:$0 sm:$0xff] }
   0x6   :  { %273 = vmatprep.subr.msk.bf16.mxu0 %vm325_vm1, %v271_v7  ;;  %278 = vmatprep.subr.msk.bf16.mxu1 %vm325_vm1, %v271_v7 }
   0x7   :  { %259 = vmatprep.mubr.msk.f32.mxu1 %vm33_vm0, %v18_v8 }
   0xd   :  { %276 = vmatpush3.bf16.xpose.msk.msra.mxu0 %vm325_vm1, %v271_v7  ;;  %280 = vmatpush3.bf16.xpose.msk.msra.mxu1 %vm325_vm1, %v271_v7 }
  0x14   :  { %254 = vmatmul.mubr.msk.f32.vlgmr.msra.gmra.mrb[0].mxu0 %vm33_vm0, %v15_v9  ;;  %260 = vmatmul.mubr.msk.f32.vlgmr.msra.gmra.mrb[0].mxu1 %vm33_vm0, %v19_v10 }
  0x15   :  { %256 = vmatprep.mubr.msk.f32.mxu0 %vm33_vm0, %v16_v11  ;;  %262 = vmatprep.mubr.msk.f32.mxu1 %vm33_vm0, %v20_v12 }
  0x18   :  { %257 = vmatmul.mubr.msk.f32.gmra.mrb[2].mxu0 %vm33_vm0, %v17_v13  ;;  %263 = vmatmul.mubr.msk.f32.gmra.mrb[2].mxu1 %vm33_vm0, %v21_v14 }
  0xe7   :  { %v255_v16 = vpop.f32.mrb[0].mxu0  ;;  %v261_v17 = vpop.f32.mrb[0].mxu1 }
  0xe8   :  { %v142_v18 = vadd.f32 %v255_v16, %v220_v15  ;;  %v162_v19 = vadd.f32 %v261_v17, %v220_v15  ;;  %v136_v20 = vpop.f32.mrb[1].mxu0  ;;  %v156_v21 = vpop.f32.mrb[1].mxu1 }
  0xe9   :  { %v137_v22 = vadd.f32 %v220_v15, %v136_v20  ;;  %v157_v23 = vadd.f32 %v220_v15, %v156_v21 }
  0xea   :  { %v176_v24 = vmax.f32 %v142_v18, 0.0  ;;  %v180_v25 = vmax.f32 %v162_v19, 0.0 }
  0xeb   :  { %v175_v26 = vmax.f32 %v137_v22, 0.0  ;;  %v179_v27 = vmax.f32 %v157_v23, 0.0  ;;  %v258_v28 = vpop.f32.mrb[2].mxu0  ;;  %v264_v29 = vpop.f32.mrb[2].mxu1 }
  0xec   :  { %v184_v30 = vsub.f32 0.0, %v176_v24  ;;  %v188_v31 = vsub.f32 0.0, %v180_v25  ;;  %v152_v32 = vadd.f32 %v258_v28, %v220_v15  ;;  %v172_v33 = vadd.f32 %v264_v29, %v220_v15  ;;  %v146_v34 = vpop.f32.mrb[3].mxu0  ;;  %v166_v35 = vpop.f32.mrb[3].mxu1 }
  0xed   :  { %v183_v36 = vsub.f32 0.0, %v175_v26  ;;  %v187_v37 = vsub.f32 0.0, %v179_v27  ;;  %v147_v38 = vadd.f32 %v220_v15, %v146_v34  ;;  %v167_v39 = vadd.f32 %v220_v15, %v166_v35 }
  0xee   :  { %v193_v40 = vmul.f32 1.442695, %v184_v30  ;;  %v201_v41 = vmul.f32 1.442695, %v188_v31  ;;  %v178_v42 = vmax.f32 %v152_v32, 0.0  ;;  %v182_v43 = vmax.f32 %v172_v33, 0.0 }
  0xef   :  { %v191_v44 = vmul.f32 1.442695, %v183_v36  ;;  %v199_v45 = vmul.f32 1.442695, %v187_v37  ;;  %v177_v46 = vmax.f32 %v147_v38, 0.0  ;;  %v181_v47 = vmax.f32 %v167_v39, 0.0 }
  0xf0   :  { %281 = vpow2.f32 %v193_v40  ;;  %v186_v48 = vsub.f32 0.0, %v178_v42  ;;  %v190_v49 = vsub.f32 0.0, %v182_v43 }
  0xf1   :  { %283 = vpow2.f32 %v201_v41  ;;  %v185_v50 = vsub.f32 0.0, %v177_v46  ;;  %v189_v51 = vsub.f32 0.0, %v181_v47 }
  0xf2   :  { %285 = vpow2.f32 %v191_v44  ;;  %v197_v52 = vmul.f32 1.442695, %v186_v48  ;;  %v205_v53 = vmul.f32 1.442695, %v190_v49 }
  0xf3   :  { %287 = vpow2.f32 %v199_v45  ;;  %v195_v54 = vmul.f32 1.442695, %v185_v50  ;;  %v203_v55 = vmul.f32 1.442695, %v189_v51 }
  0xf4   :  { %289 = vpow2.f32 %v197_v52 }
  0xf5   :  { %291 = vpow2.f32 %v205_v53 }
  0xf6   :  { %293 = vpow2.f32 %v195_v54 }
  0xf7   :  { %295 = vpow2.f32 %v203_v55 }
  0xfa   :  { %v282_v56 = vpop.eup %281 }
  0xfb   :  { %v284_v57 = vpop.eup %283  ;;  %209 = vst.msk [vmem:[%s421_s3 + $0x8] sm:$0xff] %vm207_vm2, %v282_v56 }
  0xfc   :  { %v286_v58 = vpop.eup %285  ;;  %213 = vst.msk [vmem:[%s421_s3 + $0x28] sm:$0xff] %vm207_vm2, %v284_v57 }
  0xfd   :  { %v288_v59 = vpop.eup %287  ;;  %208 = vst.msk [vmem:[%s421_s3] sm:$0xff] %vm207_vm2, %v286_v58 }
  0xfe   :  { %v290_v60 = vpop.eup %289  ;;  %212 = vst.msk [vmem:[%s421_s3 + $0x20] sm:$0xff] %vm207_vm2, %v288_v59 }
  0xff   :  { %v292_v61 = vpop.eup %291  ;;  %211 = vst.msk [vmem:[%s421_s3 + $0x18] sm:$0xff] %vm207_vm2, %v290_v60 }
 0x100   :  { %v294_v62 = vpop.eup %293  ;;  %215 = vst.msk [vmem:[%s421_s3 + $0x38] sm:$0xff] %vm207_vm2, %v292_v61 }
 0x101   :  { %v296_v63 = vpop.eup %295  ;;  %210 = vst.msk [vmem:[%s421_s3 + $0x10] sm:$0xff] %vm207_vm2, %v294_v62 }
 0x102   :  { %214 = vst.msk [vmem:[%s421_s3 + $0x30] sm:$0xff] %vm207_vm2, %v296_v63 }

</bundles_post_ra>
